<compile_context>
chip_gen: v6e
topology: v6e:2x2x1
jax: 0.10.0
libtpu: 0.0.40
codegen_flags: <defaults>
</compile_context>

<pallas_src>
import functools
import math

import jax
import jax.numpy as jnp
from jax import lax
from jax.experimental import pallas as pl
from jax.experimental.pallas import tpu as pltpu


_MAX_BLOCK_BYTES = 6 << 20     # per input block; x4 with double-buffered in+out
_VMEM_CAP_BYTES = 48 << 20     # stay well under v7x's 64 MiB physical VMEM


def _compiler_params(block_bytes):
    # 2x (in) + 2x (out) double-buffered blocks + f32 temporaries + headroom,
    # clamped so it is valid on v5e/v6e (128 MiB) and v7x (64 MiB physical).
    limit = int(min(_VMEM_CAP_BYTES, max(16 << 20, 5 * block_bytes + (4 << 20))))
    return pltpu.CompilerParams(
        dimension_semantics=("parallel",),
        vmem_limit_bytes=limit,
    )


# ---------------------------------------------------------------------------
# Kernels
# ---------------------------------------------------------------------------

def _ln_rows_kernel(x_ref, w_ref, b_ref, o_ref, *, eps):
    # x_ref: (tile_rows, C); w_ref/b_ref: (1, C); normalize over last axis.
    x = x_ref[...].astype(jnp.float32)
    mean = jnp.mean(x, axis=-1, keepdims=True)
    mean_sq = jnp.mean(x * x, axis=-1, keepdims=True)
    var = jnp.maximum(mean_sq - mean * mean, 0.0)        # biased variance
    inv = lax.rsqrt(var + eps)
    w = w_ref[...].astype(jnp.float32)
    b = b_ref[...].astype(jnp.float32)
    o_ref[...] = ((x - mean) * inv * w + b).astype(o_ref.dtype)


def _ln_channels_kernel(x_ref, w_ref, b_ref, o_ref, *, eps):
    # x_ref: (tile_n, C, S); w_ref/b_ref: (1, C, 1); normalize over axis 1.
    x = x_ref[...].astype(jnp.float32)
    mean = jnp.mean(x, axis=1, keepdims=True)
    mean_sq = jnp.mean(x * x, axis=1, keepdims=True)
    var = jnp.maximum(mean_sq - mean * mean, 0.0)        # biased variance
    inv = lax.rsqrt(var + eps)
    w = w_ref[...].astype(jnp.float32)
    b = b_ref[...].astype(jnp.float32)
    o_ref[...] = ((x - mean) * inv * w + b).astype(o_ref.dtype)


# ---------------------------------------------------------------------------
# Tiling helpers
# ---------------------------------------------------------------------------

def _pick_tile_rows(rows, max_rows):
    """Largest multiple-of-8 tile <= max_rows dividing `rows`; prefer grid>=2."""
    max_rows = max(8, min(max_rows, rows))
    best = None
    t = (max_rows // 8) * 8
    while t >= 8:
        if rows % t == 0:
            if rows // t >= 2:
                return t
            if best is None:
                best = t
        t -= 8
    return best


def _pick_tile_n(n, max_n):
    """Largest divisor of n <= max_n; prefer >= 2 grid steps when possible."""
    max_n = max(1, min(max_n, n))
    divisors = [t for t in range(1, max_n + 1) if n % t == 0]
    multi = [t for t in divisors if n // t >= 2]
    return multi[-1] if multi else divisors[-1]


# ---------------------------------------------------------------------------
# channels_last path: (rows, C), normalize over last dim
# ---------------------------------------------------------------------------

def _ln_rows(x2d, weight, bias, eps):
    rows, c = x2d.shape
    itemsize = x2d.dtype.itemsize
    max_rows = max(8, _MAX_BLOCK_BYTES // (c * itemsize))
    tile_rows = _pick_tile_rows(rows, max_rows)

    pad = 0
    if tile_rows is None:
        if rows * c * itemsize <= _MAX_BLOCK_BYTES:
            # One full-extent block (allowed regardless of (8,128) divisibility).
            tile_rows = rows
        else:
            # TODO(synk): rare ragged fallback still pads (extra HBM copy).
            tile_rows = max(8, min(2048, (max_rows // 8) * 8))
            pad = (-rows) % tile_rows
            x2d = jnp.pad(x2d, ((0, pad), (0, 0)))
    padded_rows = rows + pad
    grid = (padded_rows // tile_rows,)

    w2d = weight.reshape(1, c)
    b2d = bias.reshape(1, c)
    block_bytes = tile_rows * c * itemsize

    out = pl.pallas_call(
        functools.partial(_ln_rows_kernel, eps=eps),
        out_shape=jax.ShapeDtypeStruct((padded_rows, c), x2d.dtype),
        grid_spec=pltpu.PrefetchScalarGridSpec(
            num_scalar_prefetch=0,
            grid=grid,
            in_specs=[
                pl.BlockSpec((tile_rows, c), lambda i: (i, 0)),
                pl.BlockSpec((1, c), lambda i: (0, 0)),
                pl.BlockSpec((1, c), lambda i: (0, 0)),
            ],
            out_specs=pl.BlockSpec((tile_rows, c), lambda i: (i, 0)),
        ),
        compiler_params=_compiler_params(block_bytes),
    )(x2d, w2d, b2d)

    if pad:
        out = out[:rows]
    return out


# ---------------------------------------------------------------------------
# channels_first path: (N, C, *spatial), normalize over axis 1, no transposes
# ---------------------------------------------------------------------------

def _ln_channels_first(x, weight, bias, eps):
    n, c = x.shape[0], x.shape[1]
    spatial = x.shape[2:]
    s = int(math.prod(spatial)) if spatial else 1
    itemsize = x.dtype.itemsize
    per_image_bytes = c * s * itemsize

    if 4 * per_image_bytes > _VMEM_CAP_BYTES:
        # Block (1, C, S) would blow VMEM; fall back to transpose + row kernel.
        # TODO(synk): spatially-tiled channels_first kernel for very large H*W.
        perm = (0,) + tuple(range(2, x.ndim)) + (1,)
        x_cl = jnp.transpose(x, perm)
        y = _ln_rows(x_cl.reshape(-1, c), weight, bias, eps).reshape(x_cl.shape)
        inv_perm = (0, x.ndim - 1) + tuple(range(1, x.ndim - 1))
        return jnp.transpose(y, inv_perm)

    x3 = x.reshape(n, c, s)                      # free: just collapses trailing dims
    max_n = max(1, _MAX_BLOCK_BYTES // per_image_bytes)
    tile_n = _pick_tile_n(n, max_n)
    grid = (n // tile_n,)

    w3 = weight.reshape(1, c, 1)
    b3 = bias.reshape(1, c, 1)
    block_bytes = tile_n * per_image_bytes

    y = pl.pallas_call(
        functools.partial(_ln_channels_kernel, eps=eps),
        out_shape=jax.ShapeDtypeStruct((n, c, s), x.dtype),
        grid_spec=pltpu.PrefetchScalarGridSpec(
            num_scalar_prefetch=0,
            grid=grid,
            in_specs=[
                pl.BlockSpec((tile_n, c, s), lambda i: (i, 0, 0)),
                pl.BlockSpec((1, c, 1), lambda i: (0, 0, 0)),
                pl.BlockSpec((1, c, 1), lambda i: (0, 0, 0)),
            ],
            out_specs=pl.BlockSpec((tile_n, c, s), lambda i: (i, 0, 0)),
        ),
        compiler_params=_compiler_params(block_bytes),
    )(x3, w3, b3)
    return y.reshape(x.shape)


# ---------------------------------------------------------------------------
# Public entry point (matches LayerNorm.forward of Models/ConvNeXtV1Model.py)
# ---------------------------------------------------------------------------

def layer_norm(x, weight, bias, eps=1e-6, data_format="channels_last"):
    if data_format == "channels_last":
        orig_shape = x.shape
        c = orig_shape[-1]
        return _ln_rows(x.reshape(-1, c), weight, bias, eps).reshape(orig_shape)
    elif data_format == "channels_first":
        return _ln_channels_first(x, weight, bias, eps)
    else:
        raise NotImplementedError(data_format)


# ---------------------------------------------------------------------------
# Reference + test
# ---------------------------------------------------------------------------

def _ref_layer_norm(x, weight, bias, eps, data_format):
    if data_format == "channels_last":
        u = jnp.mean(x, axis=-1, keepdims=True)
        s = jnp.mean((x - u) ** 2, axis=-1, keepdims=True)
        return (x - u) / jnp.sqrt(s + eps) * weight + bias
    else:
        u = jnp.mean(x, axis=1, keepdims=True)
        s = jnp.mean((x - u) ** 2, axis=1, keepdims=True)
        xn = (x - u) / jnp.sqrt(s + eps)
        return weight[None, :, None, None] * xn + bias[None, :, None, None]


if __name__ == "__main__":
    key = jax.random.PRNGKey(0)
    k1, k2, k3 = jax.random.split(key, 3)

    C = 32
    # Deterministic parameter init, matching nn.Parameter(torch.ones/zeros).
    weight = jnp.ones((C,), dtype=jnp.float32)
    bias = jnp.zeros((C,), dtype=jnp.float32)

    # channels_first input: NCHW
    x_cf = jax.random.normal(k1, (2, C, 8, 8), dtype=jnp.float32)
    # channels_last input: (..., C)
    x_cl = jax.random.normal(k2, (2, 8, 8, C), dtype=jnp.float32)
    # ragged channels_last input (rows not a multiple of 8 -> full-block path)
    x_rg = jax.random.normal(k3, (3, 5, 7, C), dtype=jnp.float32)

    y_cf = jax.block_until_ready(
        layer_norm(x_cf, weight, bias, eps=1e-6, data_format="channels_first"))
    y_cl = jax.block_until_ready(
        layer_norm(x_cl, weight, bias, eps=1e-6, data_format="channels_last"))
    y_rg = jax.block_until_ready(
        layer_norm(x_rg, weight, bias, eps=1e-6, data_format="channels_last"))

    r_cf = _ref_layer_norm(x_cf, weight, bias, 1e-6, "channels_first")
    r_cl = _ref_layer_norm(x_cl, weight, bias, 1e-6, "channels_last")
    r_rg = _ref_layer_norm(x_rg, weight, bias, 1e-6, "channels_last")

    assert jnp.allclose(y_cf, r_cf, atol=1e-5, rtol=1e-5)
    assert jnp.allclose(y_cl, r_cl, atol=1e-5, rtol=1e-5)
    assert jnp.allclose(y_rg, r_rg, atol=1e-5, rtol=1e-5)
    assert y_cf.shape == x_cf.shape and y_cl.shape == x_cl.shape
    assert y_rg.shape == x_rg.shape

    print("KERNEL_OK")
</pallas_src>

<mosaic_0001>
module attributes {stable_mosaic.version = 11 : i64} {
  func.func @_ln_channels_kernel(%arg0: i32, %arg1: memref<1x32x64xf32, #tpu.memory_space<vmem>>, %arg2: memref<1x32x1xf32, #tpu.memory_space<vmem>>, %arg3: memref<1x32x1xf32, #tpu.memory_space<vmem>>, %arg4: memref<1x32x64xf32, #tpu.memory_space<vmem>>) attributes {dimension_semantics = [#tpu.dimension_semantics<parallel>], iteration_bounds = array<i64: 2>, scalar_prefetch = 0 : i64, scratch_operands = 0 : i64, tpu.core_type = #tpu.core_type<tc>, window_params = [{transform_indices = @transform_0, window_bounds = array<i64: 1, 32, 64>}, {pipeline_mode = #tpu.pipeline_mode<synchronous>, transform_indices = @transform_1, window_bounds = array<i64: 1, 32, 1>}, {pipeline_mode = #tpu.pipeline_mode<synchronous>, transform_indices = @transform_2, window_bounds = array<i64: 1, 32, 1>}, {transform_indices = @transform_3, window_bounds = array<i64: 1, 32, 64>}]} {
    %c0 = arith.constant 0 : index
    %c0_0 = arith.constant 0 : index
    %c0_1 = arith.constant 0 : index
    %0 = vector.load %arg1[%c0, %c0_0, %c0_1] : memref<1x32x64xf32, #tpu.memory_space<vmem>>, vector<1x32x64xf32>
    %cst = arith.constant dense<0.000000e+00> : vector<1x64xf32>
    %1 = vector.multi_reduction <add>, %0, %cst [1] : vector<1x32x64xf32> to vector<1x64xf32>
    %2 = vector.shape_cast %1 : vector<1x64xf32> to vector<1x1x64xf32>
    %cst_2 = arith.constant 3.200000e+01 : f32
    %3 = vector.broadcast %cst_2 : f32 to vector<1x1x64xf32>
    %4 = arith.divf %2, %3 : vector<1x1x64xf32>
    %5 = arith.mulf %0, %0 : vector<1x32x64xf32>
    %cst_3 = arith.constant dense<0.000000e+00> : vector<1x64xf32>
    %6 = vector.multi_reduction <add>, %5, %cst_3 [1] : vector<1x32x64xf32> to vector<1x64xf32>
    %7 = vector.shape_cast %6 : vector<1x64xf32> to vector<1x1x64xf32>
    %cst_4 = arith.constant 3.200000e+01 : f32
    %8 = vector.broadcast %cst_4 : f32 to vector<1x1x64xf32>
    %9 = arith.divf %7, %8 : vector<1x1x64xf32>
    %10 = arith.mulf %4, %4 : vector<1x1x64xf32>
    %11 = arith.subf %9, %10 : vector<1x1x64xf32>
    %cst_5 = arith.constant 0.000000e+00 : f32
    %12 = vector.broadcast %cst_5 : f32 to vector<1x1x64xf32>
    %13 = arith.maximumf %11, %12 : vector<1x1x64xf32>
    %cst_6 = arith.constant 9.99999997E-7 : f32
    %14 = vector.broadcast %cst_6 : f32 to vector<1x1x64xf32>
    %15 = arith.addf %13, %14 : vector<1x1x64xf32>
    %16 = math.rsqrt %15 : vector<1x1x64xf32>
    %c0_7 = arith.constant 0 : index
    %c0_8 = arith.constant 0 : index
    %c0_9 = arith.constant 0 : index
    %17 = vector.load %arg2[%c0_7, %c0_8, %c0_9] : memref<1x32x1xf32, #tpu.memory_space<vmem>>, vector<1x32x1xf32>
    %c0_10 = arith.constant 0 : index
    %c0_11 = arith.constant 0 : index
    %c0_12 = arith.constant 0 : index
    %18 = vector.load %arg3[%c0_10, %c0_11, %c0_12] : memref<1x32x1xf32, #tpu.memory_space<vmem>>, vector<1x32x1xf32>
    %19 = vector.broadcast %4 : vector<1x1x64xf32> to vector<1x32x64xf32>
    %20 = arith.subf %0, %19 : vector<1x32x64xf32>
    %21 = vector.broadcast %16 : vector<1x1x64xf32> to vector<1x32x64xf32>
    %22 = arith.mulf %20, %21 : vector<1x32x64xf32>
    %23 = vector.broadcast %17 : vector<1x32x1xf32> to vector<1x32x64xf32>
    %24 = arith.mulf %22, %23 : vector<1x32x64xf32>
    %25 = vector.broadcast %18 : vector<1x32x1xf32> to vector<1x32x64xf32>
    %26 = arith.addf %24, %25 : vector<1x32x64xf32>
    %c0_13 = arith.constant 0 : index
    %c0_14 = arith.constant 0 : index
    %c0_15 = arith.constant 0 : index
    %27 = vector.load %arg4[%c0_13, %c0_14, %c0_15] : memref<1x32x64xf32, #tpu.memory_space<vmem>>, vector<1x32x64xf32>
    tpu.vector_store %arg4[%c0_13, %c0_14, %c0_15], %26 {strides = array<i32>} : memref<1x32x64xf32, #tpu.memory_space<vmem>>, vector<1x32x64xf32>,
    return
  }
  func.func @transform_0(%arg0: i32) -> (i32, i32, i32) {
    %c0_i32 = arith.constant 0 : i32
    %c0_i32_0 = arith.constant 0 : i32
    %c0_i32_1 = arith.constant 0 : i32
    return %arg0, %c0_i32, %c0_i32_0 : i32, i32, i32
  }
  func.func @transform_1(%arg0: i32) -> (i32, i32, i32) {
    %c0_i32 = arith.constant 0 : i32
    %c0_i32_0 = arith.constant 0 : i32
    %c0_i32_1 = arith.constant 0 : i32
    %c0_i32_2 = arith.constant 0 : i32
    return %c0_i32, %c0_i32_0, %c0_i32_1 : i32, i32, i32
  }
  func.func @transform_2(%arg0: i32) -> (i32, i32, i32) {
    %c0_i32 = arith.constant 0 : i32
    %c0_i32_0 = arith.constant 0 : i32
    %c0_i32_1 = arith.constant 0 : i32
    %c0_i32_2 = arith.constant 0 : i32
    return %c0_i32, %c0_i32_0, %c0_i32_1 : i32, i32, i32
  }
  func.func @transform_3(%arg0: i32) -> (i32, i32, i32) {
    %c0_i32 = arith.constant 0 : i32
    %c0_i32_0 = arith.constant 0 : i32
    %c0_i32_1 = arith.constant 0 : i32
    return %arg0, %c0_i32, %c0_i32_0 : i32, i32, i32
  }
}

</mosaic_0001>

<bundles_post_ra>
// kernel: tpu_custom_call.1
= control target key start
LH: loop header
LB: loop body
LE: loop exit
PB: predicated region body
PF: predicated region fallthrough
CT: control target
= control target key end

     0   :  { %8 = vsyncpa [#allocation3], 0  ;;  %s644_s0 = inlined_call_operand.vmem [shape: f32[2,32,64], index: 0, kind: input, shape index: {}]   ;;  %s645_s1 = inlined_call_operand.vmem [shape: f32[1,32,1], index: 1, kind: input, shape index: {}]   ;;  %s646_s2 = inlined_call_operand.vmem [shape: f32[1,32,1], index: 2, kind: input, shape index: {}]   ;;  %s647_s3 = inlined_call_operand.hbm [shape: f32[2,32,64], index: 3, kind: output, shape index: {}]  }
   0x1   :  { %10 = vsyncpa [#allocation3 + $0x1], 0  ;;  %s502_s12 = smov 0   ;;  %s504_s13 = smov 0  }
   0x2   :  { %s506_s14 = smov 0   ;;  %s508_s15 = smov 0  }
   0x3 LB: > { %s523_s16 = sadd.s32 4294967295, %s476_s15   ;;  %s356_s17 = sadd.s32 4294967294, %s476_s15   ;;  %s476_s15 = sphi %s508_s15, %s653_s15   ;;  %s472_s14 = sphi %s506_s14, %s652_s14   ;;  %s468_s13 = sphi %s504_s13, %s651_s13   ;;  %s464_s12 = sphi %s502_s12, %s650_s12  }
   0x4   : > { %s527_s18 = sadd.s32 1, %s476_s15   ;;  %s91_s19 = sadd.s32 1, %s472_s14 }
   0x5   : > { %s88_s20 = ssub.s32 %s476_s15, %s527_s18  ;;  %p101_p0 = scmp.ne.s32.totalorder %s472_s14, %s468_s13 }
   0x6   : > { %p89_p1 = scmp.eq.s32.totalorder %s88_s20, 0  ;;  %p102_p2 = scmp.eq.s32.totalorder %s523_s16, 1 }
   0x7   : > { %p107_p3 = scmp.ne.s32.totalorder %s468_s13, %s464_s12  ;;  %p108_p4 = scmp.eq.s32.totalorder %s356_s17, 1 }
   0x8   : > { %s538_s21 = scalar_select %p89_p1, %s472_s14, %s91_s19  }
   0x9   : > { %p540_p5 = por %p102_p2, %p101_p0  ;;  %p544_p6 = por %p108_p4, %p107_p3 }
   0xa   : > { %p359_p7 = scmp.ge.s32.totalorder %s476_s15, 1  ;;  %p140_p8 = scmp.lt.s32.totalorder %s476_s15, 3 }
   0xc   : > { %p141_p9 = pnand %p359_p7, %p140_p8 }
   0xd   : > { %p164_p10 = scmp.lt.s32.totalorder (!%p141_p9), %s523_s16, 1  ;;  %s161_s27 = sand.u32 (!%p141_p9), 1, %s468_s13  }
   0xe   : > { %144 = sbr.rel (%p141_p9) target bundleno = 173 (0xad), region = 32  ;;  %s360_s28 = sshll.u32 (!%p141_p9), %s161_s27, 5 }
   0xf   : > { %s163_s29 = scalar_lea.vmem (!%p141_p9), [#allocation2], %s360_s28  ;;  %s369_s4 = sshll.u32 (!%p141_p9), %s523_s16, 9 }
  0x10   : > { %s294_s30 = sshll.u32 (!%p141_p9), %s163_s29, 4  ;;  %s598_s7 = scalar_lea.hbm (!%p141_p9), %s647_s3, %s369_s4  ;;  %s593_s30 = int_to_ptr.vmem [resolvable:$true] %s294_s30 }
  0x11   : > { %s416_s8 = scalar_lea.vmem (!%p141_p9), %s593_s30, 512  ;;  %s479_s9 = smov (!%p141_p9), [#allocation2]  }
  0x12   : > { %p417_p11 = scmp.ne.s32.totalorder (!%p141_p9), %s593_s30, %s416_s8  ;;  %s420_s10 = sshll.u32 (!%p141_p9), %s479_s9, 4  ;;  %s421_s10 = int_to_ptr.vmem [resolvable:$false] %s420_s10 }
  0x13   : > { %v214_v0 = vld [vmem:[%s645_s1 + $0x10] sm:$0xff]  ;;  %v212_v1 = vld [vmem:[%s645_s1] sm:$0xff]  ;;  %v478_v2 = vmov 0   ;;  %v215_v3 = vld [vmem:[%s645_s1 + $0x18] sm:$0xff]  ;;  %s165_s19 = scalar_select %p164_p10, %s523_s16, 1  ;;  %vm173_vm0 = vcmask 523264  }
  0x14   : > { %413 = vset.pattern.permute.xlu1 %v478_v2  ;;  %412 = vset.pattern.permute.xlu0 %v478_v2  ;;  %v213_v4 = vld [vmem:[%s645_s1 + $0x8] sm:$0xff]  ;;  %v216_v6 = vld [vmem:[%s646_s2] sm:$0xff]  ;;  %v219_v7 = vld [vmem:[%s646_s2 + $0x18] sm:$0xff]  ;;  %s604_s16 = scalar_lea.sflag [#allocation3], %s161_s27  ;;  %p418_p12 = pnand %p417_p11, %p540_p5 }
  0x15   : > { %240 = vperm.xlu1 %413, %v214_v0   ;;  %230 = vperm.xlu0 %412, %v212_v1   ;;  %v217_v5 = vld [vmem:[%s646_s2 + $0x8] sm:$0xff]  ;;  %v218_v8 = vld [vmem:[%s646_s2 + $0x10] sm:$0xff]  ;;  %s368_s20 = sshll.u32 %s165_s19, 5  ;;  %s422_s11 = scalar_lea.vmem %s421_s10, 1024 }
  0x16   : > { %s168_s26 = scalar_lea.vmem %s644_s0, %s368_s20  ;;  %p419_p13 = pneg %p418_p12 }
  0x17   : > { %v169_v9 = vld [vmem:[%s168_s26] sm:$0xff]  ;;  %v170_v10 = vld [vmem:[%s168_s26 + $0x8] sm:$0xff]  ;;  %v171_v15 = vld [vmem:[%s168_s26 + $0x10] sm:$0xff]  ;;  %p423_p0 = scmp.lt.s32.totalorder %s593_s30, %s421_s10  ;;  %p424_p1 = scmp.lt.s32.totalorder %s422_s11, %s416_s8 }
  0x18   : > { %v174_v11 = vsel %vm173_vm0, %v169_v9, 0.0  ;;  %v175_v12 = vsel %vm173_vm0, %v170_v10, 0.0  ;;  %v189_v13 = vmul.f32 %v169_v9, %v169_v9  ;;  %v190_v14 = vmul.f32 %v170_v10, %v170_v10  ;;  %v172_v21 = vld [vmem:[%s168_s26 + $0x18] sm:$0xff] }
  0x19   : > { %245 = vperm.xlu1 %413, %v215_v3   ;;  %235 = vperm.xlu0 %412, %v213_v4   ;;  %v176_v16 = vadd.f32 %v175_v12, %v174_v11  ;;  %v177_v17 = vsel %vm173_vm0, %v171_v15, 0.0  ;;  %v191_v18 = vmul.f32 %v171_v15, %v171_v15  ;;  %v179_v24 = vsel %vm173_vm0, %v172_v21, 0.0  ;;  %p425_p2 = por %p424_p1, %p423_p0 }
  0x1a   : > { %v193_v19 = vsel %vm173_vm0, %v189_v13, 0.0  ;;  %v194_v20 = vsel %vm173_vm0, %v190_v14, 0.0  ;;  %v192_v25 = vmul.f32 %v172_v21, %v172_v21 }
  0x1b   : > { %v178_v22 = vadd.f32 %v177_v17, %v176_v16  ;;  %v195_v23 = vadd.f32 %v194_v20, %v193_v19  ;;  %v196_v26 = vsel %vm173_vm0, %v191_v18, 0.0  ;;  %p426_p3 = pnand %p425_p2, %p419_p13 }
  0x1c   : > { %v198_v29 = vsel %vm173_vm0, %v192_v25, 0.0 }
  0x1d   : > { %259 = vperm.xlu1 %413, %v217_v5   ;;  %254 = vperm.xlu0 %412, %v216_v6   ;;  %v180_v27 = vadd.f32 %v179_v24, %v178_v22  ;;  %v197_v28 = vadd.f32 %v196_v26, %v195_v23 }
  0x1f   : > { %v181_v30 = vrot.slane %v180_v27, 4  ;;  %v199_v31 = vadd.f32 %v198_v29, %v197_v28 }
  0x21   : > { %269 = vperm.xlu1 %413, %v219_v7   ;;  %264 = vperm.xlu0 %412, %v218_v8   ;;  %v182_v32 = vadd.f32 %v181_v30, %v180_v27  ;;  %v200_v33 = vrot.slane %v199_v31, 4 }
  0x23   : > { %v183_v34 = vrot.slane %v182_v32, 2  ;;  %v201_v35 = vadd.f32 %v200_v33, %v199_v31 }
  0x25   : > { %v184_v36 = vadd.f32 %v183_v34, %v182_v32  ;;  %v202_v37 = vrot.slane %v201_v35, 2 }
  0x27   : > { %v185_v38 = vrot.slane %v184_v36, 1  ;;  %v203_v39 = vadd.f32 %v202_v37, %v201_v35 }
  0x29   : > { %v186_v40 = vadd.f32 %v185_v38, %v184_v36  ;;  %v204_v41 = vrot.slane %v203_v39, 1 }
  0x2b   : > { %v188_v42 = vmul.f32 0.03125, %v186_v40  ;;  %v205_v43 = vadd.f32 %v204_v41, %v203_v39 }
  0x2d   : > { %v206_v44 = vmul.f32 0.03125, %v205_v43  ;;  %v207_v45 = vmul.f32 %v188_v42, %v188_v42  ;;  %v220_v49 = vsub.f32 %v169_v9, %v188_v42  ;;  %v221_v50 = vsub.f32 %v170_v10, %v188_v42 }
  0x2e   : > { %v222_v54 = vsub.f32 %v171_v15, %v188_v42  ;;  %v223_v56 = vsub.f32 %v172_v21, %v188_v42 }
  0x2f   : > { %v208_v46 = vsub.f32 %v206_v44, %v207_v45 }
  0x31   : > { %v209_v47 = vmax.f32 %v208_v46, 0.0 }
  0x33   : > { %v210_v48 = vadd.f32 1e-06, %v209_v47 }
  0x35   : > { %414 = vrsqrt.f32 %v210_v48 }
  0x42   : > { %v415_v51 = vpop.eup %414 }
  0x43   : > { %v224_v55 = vmul.f32 %v415_v51, %v220_v49  ;;  %v225_v57 = vmul.f32 %v415_v51, %v221_v50  ;;  %v226_v60 = vmul.f32 %v415_v51, %v222_v54  ;;  %v227_v62 = vmul.f32 %v415_v51, %v223_v56 }
  0x90   : > { %v241_v52 = vpop.permute.xlu1 %240  ;;  %v231_v53 = vpop.permute.xlu0 %230 }
  0x91   : > { %v248_v61 = vmul.f32 %v231_v53, %v224_v55  ;;  %v250_v4 = vmul.f32 %v241_v52, %v226_v60 }
  0x94   : > { %v246_v58 = vpop.permute.xlu1 %245  ;;  %v236_v59 = vpop.permute.xlu0 %235 }
  0x95   : > { %v249_v63 = vmul.f32 %v236_v59, %v225_v57  ;;  %v251_v5 = vmul.f32 %v246_v58, %v227_v62 }
  0x98   : > { %v260_v0 = vpop.permute.xlu1 %259  ;;  %v255_v1 = vpop.permute.xlu0 %254 }
  0x99   : > { %v273_v2 = vadd.f32 %v260_v0, %v249_v63  ;;  %v272_v3 = vadd.f32 %v255_v1, %v248_v61 }
  0x9b   : > { %277 = vst.msk [vmem:[%s163_s29 + $0x8] sm:$0xff] %vm173_vm0, %v273_v2  ;;  %276 = vst.msk [vmem:[%s163_s29] sm:$0xff] %vm173_vm0, %v272_v3 }
  0x9c   : > { %v270_v6 = vpop.permute.xlu1 %269  ;;  %v265_v7 = vpop.permute.xlu0 %264 }
  0x9d   : > { %v275_v8 = vadd.f32 %v270_v6, %v251_v5  ;;  %v274_v9 = vadd.f32 %v265_v7, %v250_v4 }
  0x9f   : > { %279 = vst.msk [vmem:[%s163_s29 + $0x18] sm:$0xff] %vm173_vm0, %v275_v8  ;;  %278 = vst.msk [vmem:[%s163_s29 + $0x10] sm:$0xff] %vm173_vm0, %v274_v9 }
  0xa0   : > { %429 = shalt.err (!%p426_p3)
}
  0xa1   : > { %s430_s17 = scalar_lea.hbm %s598_s7, 512  ;;  %s434_s24 = scalar_lea.hbm %s647_s3, 1024 }
  0xa2   : > { %p431_p4 = scmp.ne.s32.totalorder %s598_s7, %s430_s17  ;;  %p435_p9 = scmp.lt.s32.totalorder %s598_s7, %s647_s3 }
  0xa3   : > { %p436_p10 = scmp.lt.s32.totalorder %s434_s24, %s430_s17 }
  0xa4   : > { %p432_p7 = pnand %p431_p4, %p540_p5 }
  0xa5   : > { %p437_p11 = por %p436_p10, %p435_p9 }
  0xa6   : > { %p433_p8 = pneg %p432_p7 }
  0xa8   : > { %p438_p12 = pnand %p437_p11, %p433_p8 }
  0xaa   : > { %441 = shalt.err (!%p438_p12)
}
  0xab   : > { %s480_s27 = smov 128   ;;  %s481_s28 = smov 8  }
  0xac   : > { %370 = dma.vmem_to_hbm [thread:$0]  (%p540_p5), %s593_s30, 512, %s598_s7, %s604_s16, %s480_s27, %s480_s27, %s481_s28  }
  0xad PF: > { %p376_p13 = scmp.ge.s32.totalorder %s476_s15, 2  ;;  %s309_s29 = sand.u32 1, %s464_s12  }
  0xae   : > { %s310_s4 = scalar_lea.sflag [#allocation3], %s309_s29 }
  0xaf   : > { %p373_p0 = pnand %p376_p13, %p544_p6 }
  0xb1   : > { %p374_p1 = pneg %p373_p0 }
  0xb3   : > { %459 = dma.done.wait (%p374_p1), %s310_s4, 512  }
  0xb4   : > { %461 = vsyncadd (%p374_p1), %s310_s4, 4294966784  ;;  %p13_p2 = scmp.ge.s32.totalorder %s527_s18, 4   ;;  %s650_s12 = smov %s468_s13 }
  0xb5   : > { %s651_s13 = smov %s472_s14  ;;  %s652_s14 = smov %s538_s21 }
  0xb6   : > { %s653_s15 = smov %s527_s18  ;;  %15 = sbr.rel (!%p13_p2) target bundleno = 3 (0x3), region = 67 }
  0xbb   :  { %315 = vsyncpa [#allocation3], 1 }
  0xbc   :  { %317 = vsyncpa [#allocation3 + $0x1], 1 }

</bundles_post_ra>
